<compile_context>
chip_gen: v7x
topology: tpu7x:2x2x1
jax: 0.10.0
libtpu: 0.0.40
codegen_flags: <defaults>
</compile_context>

<pallas_src>
import jax
import jax.numpy as jnp
from jax import lax
from jax.experimental import pallas as pl
from jax.experimental.pallas import tpu as pltpu

NUM_FILTERS = 4
KERNEL_SIZE = 3
BN_EPS = 1e-5

VMEM = pltpu.MemorySpace.VMEM
SMEM = pltpu.MemorySpace.SMEM


def _ceil_div(a, b):
    return -(-a // b)


# ----------------------------------------------------------------------------
# Parameter folding (host side, done ONCE in prepare_state):
#   decompress(x)[f*L + l] = sum_k wp[f,k] * x[l+k] + bp[f]
#   wp = bn1_scale * bn0_scale * conv_w
#   bp = bn1_bias + bn1_scale * bn0_bias * sum_k conv_w
#   W1[d, f*L+l] = wp[f, d-l] for 0 <= d-l < K, else 0      (banded matrix)
# ----------------------------------------------------------------------------
def fold_conv_bn(conv_w, bn0_affine, bn1_scale, bn1_bias, emb_dim):
    L = emb_dim - KERNEL_SIZE + 1
    fout = NUM_FILTERS * L
    bn0_s, bn0_b = bn0_affine[0], bn0_affine[1]
    wp = conv_w * bn0_s * bn1_scale[:, None]                           # (F, K)
    bp = bn1_bias + bn1_scale * bn0_b * jnp.sum(conv_w, axis=1)        # (F,)

    d_idx = jnp.arange(emb_dim)[:, None]                               # (D, 1)
    l_idx = jnp.arange(L)[None, :]                                     # (1, L)
    diff = d_idx - l_idx                                               # (D, L)
    valid = (diff >= 0) & (diff < KERNEL_SIZE)
    diff_c = jnp.clip(diff, 0, KERNEL_SIZE - 1)
    bands = jnp.where(valid[None, :, :], wp[:, diff_c], 0.0)           # (F, D, L)
    w1 = jnp.transpose(bands, (1, 0, 2)).reshape(emb_dim, fout)        # (D, F*L)
    bvec = jnp.repeat(bp, L).reshape(1, fout)                          # (1, F*L)
    return w1.astype(jnp.float32), bvec.astype(jnp.float32)


# ----------------------------------------------------------------------------
# Kernel 1 (query side, tiny): build g = h @ W1^T and c = h . bvec.
#   h = (e1_emb @ W1 + bvec) * (bn0_s * rel_emb + bn0_b)
# g is emitted in the table's streaming dtype (bf16 by default) so the score
# kernel's MXU contraction is the native bf16 path; all math here is f32.
# ----------------------------------------------------------------------------
def query_kernel(e1_ref, rel_ref, w1_ref, b_ref, bn0_ref, g_ref, c_ref):
    w1 = w1_ref[...]                                                   # (D, Fout)
    e1_dec = jnp.dot(e1_ref[...], w1,
                     preferred_element_type=jnp.float32) + b_ref[...]  # (Bp, Fout)
    rel_dec = rel_ref[...] * bn0_ref[0] + bn0_ref[1]                   # (Bp, Fout)
    h = e1_dec * rel_dec
    g = lax.dot_general(h, w1,
                        dimension_numbers=(((1,), (1,)), ((), ())),
                        preferred_element_type=jnp.float32)            # (Bp, D)
    g_ref[...] = g.astype(g_ref.dtype)
    c_ref[...] = jnp.sum(h * b_ref[...], axis=1, keepdims=True)        # (Bp, 1)


def query_fold(e1_emb_pad, rel_emb_pad, w1, bvec, bn0_affine, g_dtype):
    b_pad, d = e1_emb_pad.shape
    return pl.pallas_call(
        query_kernel,
        out_shape=(jax.ShapeDtypeStruct((b_pad, d), g_dtype),
                   jax.ShapeDtypeStruct((b_pad, 1), jnp.float32)),
        in_specs=[
            pl.BlockSpec(memory_space=VMEM),   # e1_emb  (Bp, D)
            pl.BlockSpec(memory_space=VMEM),   # rel_emb (Bp, Fout)
            pl.BlockSpec(memory_space=VMEM),   # W1      (D, Fout)
            pl.BlockSpec(memory_space=VMEM),   # bvec    (1, Fout)
            pl.BlockSpec(memory_space=SMEM),   # bn0 scale/bias (2,)
        ],
        out_specs=(pl.BlockSpec(memory_space=VMEM),
                   pl.BlockSpec(memory_space=VMEM)),
    )(e1_emb_pad, rel_emb_pad, w1, bvec, bn0_affine)


# ----------------------------------------------------------------------------
# Kernel 2 (score): tiled over the entity axis.  Streams the cached emb_e^T
# (D, E_pad) table tile-by-tile (auto double-buffered BlockSpec pipeline),
# one MXU contraction per tile, lane-dense (Bp, TILE_E) output.  g and c stay
# resident across grid steps (index_map returns the same block).
# ----------------------------------------------------------------------------
def score_kernel(g_ref, c_ref, et_ref, o_ref):
    logits = jnp.dot(g_ref[...], et_ref[...],
                     preferred_element_type=jnp.float32)               # (Bp, TILE_E)
    o_ref[...] = jax.nn.sigmoid(logits + c_ref[...])


def score(g, c, emb_e_t, tile_e, vmem_limit_bytes):
    b_pad, d = g.shape
    _, e_pad = emb_e_t.shape
    assert e_pad % tile_e == 0 and tile_e % 256 == 0
    grid = (e_pad // tile_e,)
    return pl.pallas_call(
        score_kernel,
        out_shape=jax.ShapeDtypeStruct((b_pad, e_pad), jnp.float32),
        grid_spec=pltpu.PrefetchScalarGridSpec(
            num_scalar_prefetch=0,
            grid=grid,
            in_specs=[
                pl.BlockSpec((b_pad, d), lambda i: (0, 0)),     # g resident
                pl.BlockSpec((b_pad, 1), lambda i: (0, 0)),     # c resident
                pl.BlockSpec((d, tile_e), lambda i: (0, i)),    # emb_e^T tile
            ],
            out_specs=pl.BlockSpec((b_pad, tile_e), lambda i: (0, i)),
        ),
        compiler_params=pltpu.CompilerParams(
            dimension_semantics=("parallel",),
            vmem_limit_bytes=vmem_limit_bytes),
    )(g, c, emb_e_t)


# ----------------------------------------------------------------------------
# Tile-size selection: big tiles (amortize per-step overhead), capped to keep
# the double-buffered working set well inside the smallest-generation VMEM
# (v7x: 64 MiB/TC), and shrunk if needed so the entity grid keeps >= 2 steps
# (megacore sharding on v7x).
# ----------------------------------------------------------------------------
def _choose_tile_e(num_entities, emb_dim, b_pad_hint, table_itemsize,
                   requested=None, budget_bytes=36 << 20, max_tile=8192):
    if requested is not None:
        return max(256, (requested // 256) * 256)
    per_col = 2 * emb_dim * table_itemsize + 2 * b_pad_hint * 4
    t = min(max_tile, max(256, ((budget_bytes // per_col) // 256) * 256))
    if num_entities > 256 and _ceil_div(num_entities, t) < 2:
        t = max(256, _ceil_div(_ceil_div(num_entities, 2), 256) * 256)
    return t


def _score_vmem_estimate(b_pad, d, tile_e, table_itemsize):
    table = 2 * d * tile_e * table_itemsize          # double-buffered input tiles
    out = 2 * b_pad * tile_e * 4                     # double-buffered output tiles
    resident = b_pad * d * 4 + b_pad * 4             # g + c (conservative f32)
    return table + out + resident


# ----------------------------------------------------------------------------
# prepare_state: build and cache everything that is static at inference time
# (folded W1/bvec, transposed + tile-padded + dtype-cast entity table).
# Call this ONCE at model-load time, not per forward call.
# ----------------------------------------------------------------------------
def prepare_state(params, *, table_dtype=jnp.bfloat16, tile_e=None, max_batch=128):
    emb_e = params["emb_e"].astype(jnp.float32)
    num_entities, emb_dim = emb_e.shape

    w1, bvec = fold_conv_bn(params["conv_w"], params["bn0_affine"],
                            params["bn1_scale"], params["bn1_bias"], emb_dim)

    b_pad_hint = max(8, ((max_batch + 7) // 8) * 8)
    itemsize = jnp.dtype(table_dtype).itemsize
    tile = _choose_tile_e(num_entities, emb_dim, b_pad_hint, itemsize, tile_e)
    e_pad = _ceil_div(num_entities, tile) * tile

    emb_e_t = jnp.zeros((emb_dim, e_pad), table_dtype).at[:, :num_entities].set(
        emb_e.T.astype(table_dtype))
    emb_e_t = jax.block_until_ready(emb_e_t)

    return dict(
        w1=w1, bvec=bvec,
        bn0_affine=params["bn0_affine"].astype(jnp.float32),
        emb_e=emb_e,                                            # f32, for e1 gather
        emb_rel=params["emb_rel"].astype(jnp.float32),
        emb_e_t=emb_e_t,                                        # cached (D, E_pad)
        num_entities=num_entities, emb_dim=emb_dim,
        tile_e=tile, table_dtype=table_dtype,
    )


# ----------------------------------------------------------------------------
# Full forward: embedding gathers + batch padding in plain JAX, then the two
# Pallas kernels.  Batch as many queries as available per call — each HBM
# pass over the entity table is amortized over all rows.
# ----------------------------------------------------------------------------
def forward(state, e1_idx, rel_idx):
    bsz = e1_idx.shape[0]
    emb_dim = state["emb_dim"]
    num_entities = state["num_entities"]
    tile_e = state["tile_e"]
    table_dtype = state["table_dtype"]

    e1_emb = state["emb_e"][e1_idx.reshape(bsz)]                       # (B, D)
    rel_emb = state["emb_rel"][rel_idx.reshape(bsz)]                   # (B, Fout)

    # Pad query batch to a multiple of 8 rows (f32 sublane granularity).
    b_pad = max(8, ((bsz + 7) // 8) * 8)
    e1_p = jnp.zeros((b_pad, emb_dim), jnp.float32).at[:bsz].set(e1_emb)
    rel_p = jnp.zeros((b_pad, rel_emb.shape[1]), jnp.float32).at[:bsz].set(rel_emb)

    g, c = query_fold(e1_p, rel_p, state["w1"], state["bvec"],
                      state["bn0_affine"], g_dtype=table_dtype)

    est = _score_vmem_estimate(b_pad, emb_dim, tile_e,
                               jnp.dtype(table_dtype).itemsize)
    vmem_limit = int(max(32 << 20, min(48 << 20, est + (8 << 20))))

    pred = score(g, c, state["emb_e_t"], tile_e, vmem_limit)           # (Bp, Ep)
    return pred[:bsz, :num_entities]


# ----------------------------------------------------------------------------
# Pure-JAX reference (direct bn0 -> conv -> bn1 -> DistMult path, mirroring
# the PyTorch module's eval-mode forward) for verification.
# ----------------------------------------------------------------------------
def forward_ref(params, e1_idx, rel_idx):
    bsz = e1_idx.shape[0]
    bn0_s, bn0_b = params["bn0_affine"][0], params["bn0_affine"][1]
    conv_w = params["conv_w"]
    bn1_s, bn1_b = params["bn1_scale"], params["bn1_bias"]

    def decompress_ref(x):
        x = x * bn0_s + bn0_b
        d = x.shape[1]
        L = d - KERNEL_SIZE + 1
        outs = []
        for f in range(NUM_FILTERS):
            acc = jnp.zeros((x.shape[0], L), jnp.float32)
            for k in range(KERNEL_SIZE):
                acc = acc + conv_w[f, k] * x[:, k:k + L]
            outs.append(acc * bn1_s[f] + bn1_b[f])
        return jnp.concatenate(outs, axis=1)

    e1_emb = params["emb_e"][e1_idx.reshape(bsz)]
    rel_emb = params["emb_rel"][rel_idx.reshape(bsz)]
    e1_dec = decompress_ref(e1_emb)
    e2_dec = decompress_ref(params["emb_e"])
    rel_dec = rel_emb * bn0_s + bn0_b
    logits = jnp.dot(e1_dec * rel_dec, e2_dec.T,
                     precision=jax.lax.Precision.HIGHEST)
    return jax.nn.sigmoid(logits)


if __name__ == "__main__":
    # Small config consistent with the module; E not a tile multiple so the
    # padding + multi-tile grid paths are exercised (auto tile_e -> 256 here,
    # giving 2 grid steps).
    num_entities = 300
    num_relations = 17
    embedding_dim = 32
    rel_emb_size = (embedding_dim - KERNEL_SIZE + 1) * NUM_FILTERS   # 120
    bsz = 2

    key = jax.random.PRNGKey(0)
    k_e, k_r, k_w, k_bn, k_i1, k_i2 = jax.random.split(key, 6)

    emb_e = jax.random.normal(k_e, (num_entities, embedding_dim), jnp.float32) * 0.1
    emb_rel = jax.random.normal(k_r, (num_relations, rel_emb_size), jnp.float32) * 0.1
    conv_w = jax.random.normal(k_w, (NUM_FILTERS, KERNEL_SIZE), jnp.float32) * 0.3

    # Eval-mode BatchNorm folded to scale/bias: y = gamma*(x-mean)/sqrt(var+eps)+beta
    kb0, kb1 = jax.random.split(k_bn)
    bn0_gamma, bn0_beta = 1.2, -0.05
    bn0_mean, bn0_var = 0.01, 0.9
    bn0_scale = bn0_gamma / jnp.sqrt(bn0_var + BN_EPS)
    bn0_affine = jnp.array([bn0_scale, bn0_beta - bn0_mean * bn0_scale], jnp.float32)

    bn1_gamma = 1.0 + 0.1 * jax.random.normal(kb0, (NUM_FILTERS,), jnp.float32)
    bn1_beta = 0.05 * jax.random.normal(kb1, (NUM_FILTERS,), jnp.float32)
    bn1_mean = jnp.zeros((NUM_FILTERS,), jnp.float32) + 0.02
    bn1_var = jnp.ones((NUM_FILTERS,), jnp.float32) * 1.1
    bn1_scale = bn1_gamma / jnp.sqrt(bn1_var + BN_EPS)
    bn1_bias = bn1_beta - bn1_mean * bn1_scale

    params = dict(emb_e=emb_e, emb_rel=emb_rel, conv_w=conv_w,
                  bn0_affine=bn0_affine, bn1_scale=bn1_scale, bn1_bias=bn1_bias)

    e1_idx = jax.random.randint(k_i1, (bsz, 1), 0, num_entities, jnp.int32)
    rel_idx = jax.random.randint(k_i2, (bsz, 1), 0, num_relations, jnp.int32)

    # --- Fast production path: cached bf16 entity table stream. --------------
    state_bf16 = prepare_state(params, table_dtype=jnp.bfloat16)
    pred = jax.block_until_ready(forward(state_bf16, e1_idx, rel_idx))

    # --- Exact path (f32 cached table) for tight numerical verification. -----
    state_f32 = prepare_state(params, table_dtype=jnp.float32)
    pred_f32 = jax.block_until_ready(forward(state_f32, e1_idx, rel_idx))

    ref = forward_ref(params, e1_idx, rel_idx)
    assert pred.shape == (bsz, num_entities)
    assert pred_f32.shape == (bsz, num_entities)

    err_f32 = float(jnp.max(jnp.abs(pred_f32 - ref)))
    assert jnp.allclose(pred_f32, ref, atol=1e-4, rtol=1e-3), \
        f"f32-table mismatch vs reference, max err {err_f32}"

    err_bf16 = float(jnp.max(jnp.abs(pred - ref)))
    assert jnp.allclose(pred, ref, atol=5e-3, rtol=5e-3), \
        f"bf16-table mismatch vs reference, max err {err_bf16}"

    print("KERNEL_OK")
</pallas_src>

<mosaic_0001>
module attributes {stable_mosaic.version = 11 : i64} {
  func.func @query_kernel(%arg0: memref<8x32xf32, #tpu.memory_space<vmem>>, %arg1: memref<8x120xf32, #tpu.memory_space<vmem>>, %arg2: memref<32x120xf32, #tpu.memory_space<vmem>>, %arg3: memref<1x120xf32, #tpu.memory_space<vmem>>, %arg4: memref<2xf32, #tpu.memory_space<smem>>, %arg5: memref<8x32xbf16, #tpu.memory_space<vmem>>, %arg6: memref<8x1xf32, #tpu.memory_space<vmem>>) attributes {dimension_semantics = [], scalar_prefetch = 0 : i64, scratch_operands = 0 : i64, tpu.core_type = #tpu.core_type<tc>} {
    %c0 = arith.constant 0 : index
    %c0_0 = arith.constant 0 : index
    %0 = vector.load %arg2[%c0, %c0_0] : memref<32x120xf32, #tpu.memory_space<vmem>>, vector<32x120xf32>
    %c0_1 = arith.constant 0 : index
    %c0_2 = arith.constant 0 : index
    %1 = vector.load %arg0[%c0_1, %c0_2] : memref<8x32xf32, #tpu.memory_space<vmem>>, vector<8x32xf32>
    %cst = arith.constant dense<0.000000e+00> : vector<8x120xf32>
    %2 = tpu.matmul %1, %0, %cst {dimension_numbers = #tpu.dot_dimension_numbers<[1], [0], [0], [1], [0, 0, 1, 1], [], []>} : vector<8x32xf32>, vector<32x120xf32>, vector<8x120xf32> -> vector<8x120xf32>
    %c0_3 = arith.constant 0 : index
    %c0_4 = arith.constant 0 : index
    %3 = vector.load %arg3[%c0_3, %c0_4] : memref<1x120xf32, #tpu.memory_space<vmem>>, vector<1x120xf32>
    %4 = vector.broadcast %3 : vector<1x120xf32> to vector<8x120xf32>
    %5 = arith.addf %2, %4 : vector<8x120xf32>
    %c0_5 = arith.constant 0 : index
    %c0_6 = arith.constant 0 : index
    %6 = vector.load %arg1[%c0_5, %c0_6] : memref<8x120xf32, #tpu.memory_space<vmem>>, vector<8x120xf32>
    %c0_7 = arith.constant 0 : index
    %7 = memref.load %arg4[%c0_7] : memref<2xf32, #tpu.memory_space<smem>>
    %8 = vector.broadcast %7 : f32 to vector<8x120xf32>
    %9 = arith.mulf %6, %8 : vector<8x120xf32>
    %c1 = arith.constant 1 : index
    %10 = memref.load %arg4[%c1] : memref<2xf32, #tpu.memory_space<smem>>
    %11 = vector.broadcast %10 : f32 to vector<8x120xf32>
    %12 = arith.addf %9, %11 : vector<8x120xf32>
    %13 = arith.mulf %5, %12 : vector<8x120xf32>
    %cst_8 = arith.constant dense<0.000000e+00> : vector<8x32xf32>
    %14 = tpu.matmul %13, %0, %cst_8 {dimension_numbers = #tpu.dot_dimension_numbers<[1], [1], [0], [0], [0, 0, 1, 0], [], []>} : vector<8x120xf32>, vector<32x120xf32>, vector<8x32xf32> -> vector<8x32xf32>
    %15 = arith.truncf %14 : vector<8x32xf32> to vector<8x32xbf16>
    %c0_9 = arith.constant 0 : index
    %c0_10 = arith.constant 0 : index
    %16 = vector.load %arg5[%c0_9, %c0_10] : memref<8x32xbf16, #tpu.memory_space<vmem>>, vector<8x32xbf16>
    tpu.vector_store %arg5[%c0_9, %c0_10], %15 {strides = array<i32>} : memref<8x32xbf16, #tpu.memory_space<vmem>>, vector<8x32xbf16>,
    %c0_11 = arith.constant 0 : index
    %c0_12 = arith.constant 0 : index
    %17 = vector.load %arg3[%c0_11, %c0_12] : memref<1x120xf32, #tpu.memory_space<vmem>>, vector<1x120xf32>
    %18 = vector.broadcast %17 : vector<1x120xf32> to vector<8x120xf32>
    %19 = arith.mulf %13, %18 : vector<8x120xf32>
    %cst_13 = arith.constant dense<0.000000e+00> : vector<8xf32>
    %20 = vector.multi_reduction <add>, %19, %cst_13 [1] : vector<8x120xf32> to vector<8xf32>
    %21 = vector.shape_cast %20 : vector<8xf32> to vector<8x1xf32>
    %c0_14 = arith.constant 0 : index
    %c0_15 = arith.constant 0 : index
    %22 = vector.load %arg6[%c0_14, %c0_15] : memref<8x1xf32, #tpu.memory_space<vmem>>, vector<8x1xf32>
    tpu.vector_store %arg6[%c0_14, %c0_15], %21 {strides = array<i32>} : memref<8x1xf32, #tpu.memory_space<vmem>>, vector<8x1xf32>,
    return
  }
}

</mosaic_0001>

<bundles_post_ra>
// kernel: tpu_custom_call.1
= control target key start
LH: loop header
LB: loop body
LE: loop exit
PB: predicated region body
PF: predicated region fallthrough
CT: control target
= control target key end

     0   :  { %12 = vsyncpa [#allocation3], 0  ;;  %s569_s0 = inlined_call_operand.hbm [shape: f32[8,32], index: 0, kind: input, shape index: {}]   ;;  %s570_s1 = inlined_call_operand.hbm [shape: f32[8,120], index: 1, kind: input, shape index: {}]   ;;  %s571_s2 = inlined_call_operand.hbm [shape: f32[32,120], index: 2, kind: input, shape index: {}]   ;;  %s572_s3 = inlined_call_operand.vmem [shape: f32[1,120], index: 3, kind: input, shape index: {}]   ;;  %s573_s4 = inlined_call_operand.vmem [shape: f32[2], index: 4, kind: input, shape index: {}]   ;;  %s574_s5 = inlined_call_operand.hbm [shape: bf16[8,32], index: 5, kind: output, shape index: {0}]   ;;  %s575_s6 = inlined_call_operand.vmem [shape: f32[8,1], index: 6, kind: output, shape index: {1}]  }
   0x1   :  { %13 = vsyncpa [#allocation7], 0 }
   0x2   :  { %14 = vsyncpa [#allocation5], 0 }
   0x3   :  { %15 = vsyncpa [#allocation4], 0  ;;  %s463_s21 = smov [#allocation6]   ;;  %s464_s23 = smov [#allocation2]  }
   0x4   :  { %s32_s22 = sshll.u32 %s463_s21, 4  ;;  %s22_s24 = sshll.u32 %s464_s23, 4  ;;  %s33_s22 = int_to_ptr.vmem [resolvable:$true] %s32_s22  ;;  %s23_s24 = int_to_ptr.vmem [resolvable:$true] %s22_s24 }
   0x5   :  { %s355_s27 = scalar_lea.hbm %s570_s1, 128 }
   0x6   :  { %p356_p0 = scmp.ne.s32.totalorder %s570_s1, %s355_s27  ;;  %p359_p1 = scmp.lt.u32.totalorder %s355_s27, %s570_s1 }
   0x8   :  { %p361_p2 = pnand %p359_p1, %p356_p0 }
   0xa   :  { %364 = shalt.err (!%p361_p2)
}
   0xb   :  { %s365_s8 = scalar_lea.vmem %s33_s22, 128  ;;  %p370_p4 = scmp.lt.s32.totalorder %s33_s22, %s33_s22 }
   0xc   :  { %p366_p3 = scmp.ne.s32.totalorder %s33_s22, %s365_s8  ;;  %p371_p5 = scmp.lt.s32.totalorder %s365_s8, %s365_s8 }
   0xe   :  { %p372_p6 = por %p371_p5, %p370_p4 }
  0x10   :  { %p373_p7 = pnand %p372_p6, %p366_p3 }
  0x12   :  { %376 = shalt.err (!%p373_p7)
}
  0x13   :  { %35 = dma.hbm_to_vmem [thread:$0]  %s570_s1, 128, %s33_s22, [#allocation7]  }
  0x14   :  { %s377_s13 = scalar_lea.hbm %s569_s0, 128 }
  0x15   :  { %p378_p8 = scmp.ne.s32.totalorder %s569_s0, %s377_s13  ;;  %p381_p9 = scmp.lt.u32.totalorder %s377_s13, %s569_s0 }
  0x17   :  { %p383_p10 = pnand %p381_p9, %p378_p8 }
  0x19   :  { %386 = shalt.err (!%p383_p10)
}
  0x1a   :  { %s387_s18 = scalar_lea.vmem %s23_s24, 128  ;;  %p392_p12 = scmp.lt.s32.totalorder %s23_s24, %s23_s24 }
  0x1b   :  { %p388_p11 = scmp.ne.s32.totalorder %s23_s24, %s387_s18  ;;  %p393_p13 = scmp.lt.s32.totalorder %s387_s18, %s387_s18 }
  0x1d   :  { %p394_p0 = por %p393_p13, %p392_p12 }
  0x1f   :  { %p395_p1 = pnand %p394_p0, %p388_p11 }
  0x21   :  { %398 = shalt.err (!%p395_p1)
}
  0x22   :  { %25 = dma.hbm_to_vmem [thread:$0]  %s569_s0, 128, %s23_s24, [#allocation3]  }
  0x23   :  { %s465_s20 = smov [#allocation8]   ;;  %s56_s25 = sshll.u32 %s573_s4, 4  ;;  %s57_s25 = int_to_ptr.vmem [resolvable:$true] %s56_s25 }
  0x24   :  { %s41_s21 = sshll.u32 %s465_s20, 4  ;;  %s399_s28 = scalar_lea.hbm %s571_s2, 512  ;;  %s42_s21 = int_to_ptr.vmem [resolvable:$true] %s41_s21 }
  0x25   :  { %p400_p2 = scmp.ne.s32.totalorder %s571_s2, %s399_s28  ;;  %p403_p3 = scmp.lt.u32.totalorder %s399_s28, %s571_s2 }
  0x27   :  { %p405_p4 = pnand %p403_p3, %p400_p2 }
  0x29   :  { %408 = shalt.err (!%p405_p4)
}
  0x2a   :  { %s409_s0 = scalar_lea.vmem %s42_s21, 512  ;;  %p414_p6 = scmp.lt.s32.totalorder %s42_s21, %s42_s21 }
  0x2b   :  { %p410_p5 = scmp.ne.s32.totalorder %s42_s21, %s409_s0  ;;  %p415_p7 = scmp.lt.s32.totalorder %s409_s0, %s409_s0 }
  0x2d   :  { %p416_p8 = por %p415_p7, %p414_p6 }
  0x2f   :  { %p417_p9 = pnand %p416_p8, %p410_p5 }
  0x31   :  { %420 = shalt.err (!%p417_p9)
}
  0x32   :  { %s466_s4 = smov 128   ;;  %s467_s24 = smov 8  }
  0x33   :  { %47 = dma.hbm_to_vmem [thread:$0]  %s571_s2, 512, %s42_s21, [#allocation7], %s466_s4, %s466_s4, %s467_s24  }
  0x34   :  { %s421_s11 = scalar_lea.vmem %s57_s25, 16  ;;  %p426_p11 = scmp.lt.s32.totalorder %s57_s25, %s57_s25 }
  0x35   :  { %p422_p10 = scmp.ne.s32.totalorder %s57_s25, %s421_s11  ;;  %p427_p12 = scmp.lt.s32.totalorder %s421_s11, %s421_s11 }
  0x37   :  { %p428_p13 = por %p427_p12, %p426_p11 }
  0x39   :  { %p429_p0 = pnand %p428_p13, %p422_p10 }
  0x3b   :  { %432 = shalt.err (!%p429_p0)
}
  0x3c   :  { %s468_s12 = smov [#allocation9]  }
  0x3d   :  { %59 = dma.vmem_to_smem %s57_s25, 16, %s468_s12, [#allocation5]  }
  0x3e   :  { %455 = dma.done.wait [#allocation3], 128  }
  0x3f   :  { %456 = vsyncadd [#allocation3], 4294967168 }
  0x40   :  { %457 = dma.done.wait [#allocation7], 640  }
  0x41   :  { %458 = vsyncadd [#allocation7], 4294966656 }
  0x42   :  { %459 = dma.done.wait [#allocation5], 16  }
  0x43   :  { %460 = vsyncadd [#allocation5], 4294967280 }
  0x44   :  { %72 = sfence }
  0x45   :  { %v73_v0 = vld [vmem:[#allocation8] sm:$0xff]  ;;  %v74_v1 = vld [vmem:[#allocation8 + $0x8] sm:$0xff]  ;;  %v75_v2 = vld [vmem:[#allocation8 + $0x10] sm:$0xff]  ;;  %v469_v3 = vmov 0.0|0.0   ;;  %vm470_vm0 = vmmov 0   ;;  %v471_v6 = vmov 0.0  }
  0x46   :  { %331 = vmatprep.subr.bf16.mxu0 %v469_v3  ;;  %v332_v4 = vpack.c.bf16 %v74_v1, %v73_v0  ;;  %v76_v5 = vld [vmem:[#allocation8 + $0x18] sm:$0xff]  ;;  %317 = vmatprep.mubr.msk.f32.mxu0 %vm470_vm0, %v471_v6  ;;  %vm167_vm1 = vcmask 982016   ;;  %v77_v8 = vld [vmem:[#allocation2] sm:$0xff]  ;;  %vm85_vm3 = vcmask 261120   ;;  %s160_s2 = sld [smem:[#allocation9]]  ;;  %s292_s13 = sld [smem:[#allocation9 + $0x1]] }
  0x47   :  { %337 = vmatprep.subr.bf16.mxu1 %v469_v3  ;;  %vm339_vm2 = vmpackc.low %vm167_vm1, %vm167_vm1  ;;  %328 = vmatprep.mubr.msk.f32.mxu1 %vm470_vm0, %v471_v6  ;;  %v335_v7 = vpack.c.bf16 %v76_v5, %v75_v2  ;;  %v159_v9 = vld [vmem:[#allocation6] sm:$0xff]  ;;  %v290_v13 = vld [vmem:[%s572_s3] ss:$0 sm:$0xff]  ;;  %vm267_vm4 = vcmask 7168   ;;  %s472_s18 = smov [#allocation10]   ;;  %vm254_vm5 = vcmask 257024  }
  0x48   :  { %333 = vmatpush3.bf16.msra.mxu0 %v332_v4  ;;  %340 = vmatpush3.bf16.xpose.msk.msra.mxu1 %vm339_vm2, %v332_v4  ;;  %s275_s1 = sshll.u32 %s472_s18, 4  ;;  %s276_s1 = int_to_ptr.vmem [resolvable:$true] %s275_s1 }
  0x49   :  { %334 = vmatprep.subr.bf16.mxu0 %v469_v3  ;;  %341 = vmatprep.subr.bf16.mxu1 %v469_v3  ;;  %s433_s3 = scalar_lea.vmem %s276_s1, 64  ;;  %p438_p2 = scmp.lt.s32.totalorder %s276_s1, %s276_s1 }
  0x4a   :  { %p434_p1 = scmp.ne.s32.totalorder %s276_s1, %s433_s3  ;;  %p439_p3 = scmp.lt.s32.totalorder %s433_s3, %s433_s3 }
  0x4c   :  { %336 = vmatpush3.bf16.msra.mxu0 %v335_v7  ;;  %v161_v10 = vstv %s160_s2  ;;  %v164_v12 = vstv %s292_s13  ;;  %p440_p4 = por %p439_p3, %p438_p2 }
  0x4d   :  { %v162_v11 = vmul.f32 %v161_v10, %v159_v9 }
  0x4e   :  { %p441_p5 = pnand %p440_p4, %p434_p1 }
  0x4f   :  { %318 = vmatmul.mubr.msk.f32.vlgmr.msra.gmra.mrb[0].mxu0 %vm85_vm3, %v77_v8  ;;  %v165_v14 = vadd.f32 %v164_v12, %v162_v11 }
  0x50   :  { %344 = vmatpush3.bf16.xpose.msk.msra.mxu1 %vm339_vm2, %v335_v7 }
 0x122   :  { %v155_v15 = vpop.f32.mrb[0].mxu0 }
 0x123   :  { %v156_v16 = vadd.f32 %v290_v13, %v155_v15  ;;  %v319_v17 = vpop.f32.mrb[1].mxu0 }
 0x125   :  { %v166_v18 = vmul.f32 %v165_v14, %v156_v16 }
 0x127   :  { %329 = vmatmul.mubr.msk.f32.vlgmr.msra.gmra.mrb[0].mxu1 %vm167_vm1, %v166_v18  ;;  %v263_v19 = vmul.f32 %v290_v13, %v166_v18 }
 0x129   :  { %v264_v20 = vsel %vm167_vm1, %v263_v19, 0.0 }
 0x12a   :  { %265 = vadd.xlane.f32.xlu0 %v264_v20 }
 0x1b7   :  { %v266_v21 = vpop.xlane.xlu0 %265 }
 0x1b8   :  { %268 = vst.msk [vmem:[%s575_s6] sm:$0xff] %vm267_vm4, %v266_v21 }
 0x1fa   :  { %v249_v22 = vpop.f32.mrb[0].mxu1 }
 0x1fb   :  { %v253_v23 = vpack.c.bf16 %v249_v22, %v249_v22  ;;  %v330_v24 = vpop.f32.mrb[1].mxu1 }
 0x1fd   :  { %255 = vst.msk [vmem:[#allocation10] sm:$0xf] %vm254_vm5, %v253_v23 }
 0x1fe   :  { %444 = shalt.err (!%p441_p5)
}
 0x1ff   :  { %s445_s21 = scalar_lea.hbm %s574_s5, 64 }
 0x200   :  { %p446_p6 = scmp.ne.s32.totalorder %s574_s5, %s445_s21  ;;  %p449_p7 = scmp.lt.u32.totalorder %s445_s21, %s574_s5 }
 0x202   :  { %p451_p8 = pnand %p449_p7, %p446_p6 }
 0x204   :  { %454 = shalt.err (!%p451_p8)
}
 0x205   :  { %278 = dma.vmem_to_hbm [thread:$0]  %s276_s1, 64, %s574_s5, [#allocation4]  }
 0x206   :  { %461 = dma.done.wait [#allocation4], 64  }
 0x207   :  { %462 = vsyncadd [#allocation4], 4294967232 }
 0x208   :  { %286 = vsyncpa [#allocation3], 1 }
 0x209   :  { %287 = vsyncpa [#allocation7], 1 }
 0x20a   :  { %288 = vsyncpa [#allocation4], 1 }
 0x20b   :  { %289 = vsyncpa [#allocation5], 1 }

</bundles_post_ra>
